<compile_context>
chip_gen: v7x
topology: tpu7x:2x2x1
jax: 0.10.0
libtpu: 0.0.40
codegen_flags: <defaults>
</compile_context>

<pallas_src>
import math
import functools

import jax
import jax.numpy as jnp
from jax.experimental import pallas as pl
from jax.experimental.pallas import tpu as pltpu


def _round_up(x, m):
    return ((x + m - 1) // m) * m


def _arcface_kernel(labels_ref, logits_ref, out_ref, *, cos_m, sin_m, scale, tc):
    x = logits_ref[...].astype(jnp.float32)                 # (tb, tc)

    # Shift the labels into this C-tile's local column space (per-row op).
    labels_local = labels_ref[...] - pl.program_id(1) * tc   # (tb, 1) int32
    col = jax.lax.broadcasted_iota(jnp.int32, x.shape, dimension=1)
    # Negative labels (-1 sentinel) can never equal a local column >= 0,
    # so no explicit `labels != -1` check is needed.
    is_target = col == labels_local                          # (tb, tc) bool

    # Selected-coefficient closed form of cos(arccos(x) + m) * s:
    #   target:     s*cos_m * x - s*sin_m * sqrt(1 - x^2)
    #   non-target: s       * x - 0      * sqrt(1 - x^2)
    # sqrt(neg) = NaN and NaN*0 = NaN keep torch's NaN-for-|x|>1 behaviour
    # on both paths.
    a = jnp.where(is_target, jnp.float32(scale * cos_m), jnp.float32(scale))
    b = jnp.where(is_target, jnp.float32(scale * sin_m), jnp.float32(0.0))
    out = x * a - jnp.sqrt(jnp.float32(1.0) - x * x) * b
    out_ref[...] = out.astype(out_ref.dtype)


def arcface_insightface(logits, labels, *, s=64.0, margin=0.5, tb=256, tc=4096):
    """logits: (B, C) float (f32 or bf16), labels: (B,) int (-1 == no target)."""
    B, C = logits.shape
    out_dtype = logits.dtype

    # Clamp tiles to the array extents, keeping (8,128) alignment.
    tb_eff = min(tb, _round_up(B, 8))
    tc_eff = min(tc, _round_up(C, 128))

    # Megacore: ensure >= 2 grid blocks along a parallel axis when possible.
    if pl.cdiv(B, tb_eff) * pl.cdiv(C, tc_eff) < 2:
        if C > 128:
            tc_eff = _round_up(pl.cdiv(C, 2), 128)
        elif B > 8:
            tb_eff = _round_up(pl.cdiv(B, 2), 8)
    grid = (pl.cdiv(B, tb_eff), pl.cdiv(C, tc_eff))

    # Labels as a (B, 1) int32 column; no padding of logits or labels —
    # partial edge blocks are handled by Pallas (padded reads, masked writes).
    labels2d = labels.astype(jnp.int32).reshape(B, 1)

    # VMEM limit from the actual double-buffered footprint (+ headroom).
    itemsize = jnp.dtype(logits.dtype).itemsize
    buf_bytes = tb_eff * tc_eff * itemsize
    vmem_limit = int(2 * (buf_bytes + buf_bytes) + 8 * 1024 * 1024)
    vmem_limit = min(max(vmem_limit, 16 * 1024 * 1024), 100 * 1024 * 1024)

    kernel = functools.partial(
        _arcface_kernel,
        cos_m=math.cos(margin),
        sin_m=math.sin(margin),
        scale=float(s),
        tc=tc_eff,
    )

    out = pl.pallas_call(
        kernel,
        out_shape=jax.ShapeDtypeStruct((B, C), out_dtype),
        grid_spec=pltpu.PrefetchScalarGridSpec(
            num_scalar_prefetch=0,
            grid=grid,
            in_specs=[
                pl.BlockSpec((tb_eff, 1), lambda i, j: (i, 0)),        # labels
                pl.BlockSpec((tb_eff, tc_eff), lambda i, j: (i, j)),   # logits
            ],
            out_specs=pl.BlockSpec((tb_eff, tc_eff), lambda i, j: (i, j)),
        ),
        compiler_params=pltpu.CompilerParams(
            dimension_semantics=("parallel", "parallel"),
            vmem_limit_bytes=vmem_limit,
        ),
    )(labels2d, logits)
    return out


def _reference(logits, labels, s=64.0, margin=0.5):
    # pure-JAX reference of the PyTorch forward (transcendental path)
    B, C = logits.shape
    theta = jnp.arccos(logits.astype(jnp.float32))
    col = jnp.arange(C)[None, :]
    is_target = (col == labels[:, None]) & (labels[:, None] != -1)
    theta = jnp.where(is_target, theta + margin, theta)
    return jnp.cos(theta) * s


if __name__ == "__main__":
    key = jax.random.PRNGKey(0)
    k1, k2 = jax.random.split(key)
    # Deliberately non-multiples of (8, 128) to exercise partial edge blocks.
    B, C = 18, 1000
    logits = jax.random.uniform(k1, (B, C), jnp.float32, minval=-1.0, maxval=1.0)
    labels = jax.random.randint(k2, (B,), 0, C, dtype=jnp.int32)
    labels = labels.at[0].set(7)          # known target column for row 0
    labels = labels.at[3].set(-1)         # "ignored" row, exercises the -1 path
    labels = labels.at[5].set(999)        # target in the last (partial) C tile
    logits = logits.at[0, 5].set(1.5)     # |x| > 1, non-target -> NaN path
    logits = logits.at[0, 7].set(0.8)     # in-range target

    ref = _reference(logits, labels)

    # 1) default tiles -> megacore-adjusted grid (1, 2) with partial edges
    out_big = jax.block_until_ready(arcface_insightface(logits, labels))
    # 2) small explicit tiles -> multi-step grid on both axes (3 x 4)
    out_small = jax.block_until_ready(
        arcface_insightface(logits, labels, tb=8, tc=256))

    for out in (out_big, out_small):
        assert out.shape == (B, C)
        assert bool(jnp.isnan(out[0, 5])) and bool(jnp.isnan(ref[0, 5]))
        assert jnp.allclose(out, ref, atol=5e-4, rtol=1e-4, equal_nan=True), \
            "mismatch vs reference"

    # 3) bf16 input path (halved HBM traffic); output stays in bf16.
    logits_bf16 = logits.astype(jnp.bfloat16)
    out_bf16 = jax.block_until_ready(arcface_insightface(logits_bf16, labels))
    ref_bf16 = _reference(logits_bf16.astype(jnp.float32), labels)
    assert out_bf16.dtype == jnp.bfloat16
    assert bool(jnp.isnan(out_bf16[0, 5].astype(jnp.float32)))
    assert jnp.allclose(out_bf16.astype(jnp.float32), ref_bf16,
                        atol=0.5, rtol=2e-2, equal_nan=True), \
        "bf16 mismatch vs reference"

    print("KERNEL_OK")
</pallas_src>

<mosaic_0001>
module attributes {stable_mosaic.version = 11 : i64} {
  func.func @_arcface_kernel(%arg0: i32, %arg1: i32, %arg2: memref<24x1xi32, #tpu.memory_space<vmem>>, %arg3: memref<24x512xf32, #tpu.memory_space<vmem>>, %arg4: memref<24x512xf32, #tpu.memory_space<vmem>>) attributes {dimension_semantics = [#tpu.dimension_semantics<parallel>, #tpu.dimension_semantics<parallel>], iteration_bounds = array<i64: 1, 2>, scalar_prefetch = 0 : i64, scratch_operands = 0 : i64, tpu.core_type = #tpu.core_type<tc>, window_params = [{transform_indices = @transform_0, window_bounds = array<i64: 24, 1>}, {transform_indices = @transform_1, window_bounds = array<i64: 24, 512>}, {transform_indices = @transform_2, window_bounds = array<i64: 24, 512>}]} {
    %c0 = arith.constant 0 : index
    %c0_0 = arith.constant 0 : index
    %0 = vector.load %arg3[%c0, %c0_0] : memref<24x512xf32, #tpu.memory_space<vmem>>, vector<24x512xf32>
    %c0_1 = arith.constant 0 : index
    %c0_2 = arith.constant 0 : index
    %1 = vector.load %arg2[%c0_1, %c0_2] : memref<24x1xi32, #tpu.memory_space<vmem>>, vector<24x1xi32>
    %c512_i32 = arith.constant 512 : i32
    %2 = arith.muli %arg1, %c512_i32 : i32
    %3 = vector.broadcast %2 : i32 to vector<24x1xi32>
    %4 = arith.subi %1, %3 : vector<24x1xi32>
    %5 = tpu.iota {dimensions = array<i32: 1>} : vector<24x512xi32>
    %6 = vector.broadcast %4 : vector<24x1xi32> to vector<24x512xi32>
    %7 = arith.cmpi eq, %5, %6 : vector<24x512xi32>
    %cst = arith.constant 56.1652832 : f32
    %cst_3 = arith.constant 6.400000e+01 : f32
    %8 = vector.broadcast %cst : f32 to vector<24x512xf32>
    %9 = vector.broadcast %cst_3 : f32 to vector<24x512xf32>
    %10 = arith.select %7, %8, %9 : vector<24x512xi1>, vector<24x512xf32>
    %cst_4 = arith.constant 30.6832352 : f32
    %cst_5 = arith.constant 0.000000e+00 : f32
    %11 = vector.broadcast %cst_4 : f32 to vector<24x512xf32>
    %12 = vector.broadcast %cst_5 : f32 to vector<24x512xf32>
    %13 = arith.select %7, %11, %12 : vector<24x512xi1>, vector<24x512xf32>
    %14 = arith.mulf %0, %10 : vector<24x512xf32>
    %15 = arith.mulf %0, %0 : vector<24x512xf32>
    %cst_6 = arith.constant 1.000000e+00 : f32
    %16 = vector.broadcast %cst_6 : f32 to vector<24x512xf32>
    %17 = arith.subf %16, %15 : vector<24x512xf32>
    %18 = math.sqrt %17 : vector<24x512xf32>
    %19 = arith.mulf %18, %13 : vector<24x512xf32>
    %20 = arith.subf %14, %19 : vector<24x512xf32>
    %c0_7 = arith.constant 0 : index
    %c0_8 = arith.constant 0 : index
    %21 = vector.load %arg4[%c0_7, %c0_8] : memref<24x512xf32, #tpu.memory_space<vmem>>, vector<24x512xf32>
    tpu.vector_store %arg4[%c0_7, %c0_8], %20 {strides = array<i32>} : memref<24x512xf32, #tpu.memory_space<vmem>>, vector<24x512xf32>,
    return
  }
  func.func @transform_0(%arg0: i32, %arg1: i32) -> (i32, i32) {
    %c0_i32 = arith.constant 0 : i32
    %c0_i32_0 = arith.constant 0 : i32
    return %arg0, %c0_i32 : i32, i32
  }
  func.func @transform_1(%arg0: i32, %arg1: i32) -> (i32, i32) {
    %c0_i32 = arith.constant 0 : i32
    return %arg0, %arg1 : i32, i32
  }
  func.func @transform_2(%arg0: i32, %arg1: i32) -> (i32, i32) {
    %c0_i32 = arith.constant 0 : i32
    return %arg0, %arg1 : i32, i32
  }
}

</mosaic_0001>

<bundles_post_ra>
// kernel: tpu_custom_call.1
= control target key start
LH: loop header
LB: loop body
LE: loop exit
PB: predicated region body
PF: predicated region fallthrough
CT: control target
= control target key end

     0   :  { %7 = vsyncpa [#allocation3], 0  ;;  %s1316_s0 = inlined_call_operand.vmem [shape: s32[18,1], index: 0, kind: input, shape index: {}]   ;;  %s1317_s1 = inlined_call_operand.hbm [shape: f32[18,1000], index: 1, kind: input, shape index: {}]   ;;  %s1318_s2 = inlined_call_operand.hbm [shape: f32[18,1000], index: 2, kind: output, shape index: {}]  }
   0x1   :  { %9 = vsyncpa [#allocation3 + $0x1], 0 }
   0x2   :  { %10 = vsyncpa [#allocation4], 0 }
   0x3   :  { %12 = vsyncpa [#allocation4 + $0x1], 0  ;;  %s806_s9 = smov 0   ;;  %s808_s10 = smov 0  }
   0x4   :  { %s810_s11 = smov 0   ;;  %s812_s12 = smov 0  }
   0x5   :  { %s814_s13 = smov 0   ;;  %s816_s14 = smov 0  }
   0x6 LB: > { %s552_s15 = sadd.s32 4294967295, %s778_s14   ;;  %s553_s16 = sadd.s32 4294967294, %s778_s14   ;;  %s778_s14 = sphi %s816_s14, %s18_s14   ;;  %s774_s13 = sphi %s814_s13, %s1334_s13   ;;  %s770_s12 = sphi %s812_s12, %s1333_s12   ;;  %s766_s11 = sphi %s810_s11, %s1332_s11   ;;  %s762_s10 = sphi %s808_s10, %s1331_s10   ;;  %s758_s9 = sphi %s806_s9, %s1330_s9  }
   0x7   : > { %s27_s17 = sadd.s32 1, %s774_s13  ;;  %s65_s18 = sadd.s32 1, %s766_s11 }
   0x8   : > { %p28_p0 = scmp.ge.s32.totalorder %s27_s17, 2  ;;  %p72_p1 = scmp.ne.s32.totalorder %s766_s11, %s762_s10 }
   0x9   : > { %p73_p2 = scmp.eq.s32.totalorder %s778_s14, 0  ;;  %p78_p3 = scmp.ne.s32.totalorder %s762_s10, %s758_s9 }
   0xa   : > { %s1336_s17 = smov (%p28_p0, %s27_s17), 0  ;;  %p79_p5 = scmp.eq.s32.totalorder %s552_s15, 0 }
   0xb   : > { %p847_p4 = por %p73_p2, %p72_p1  ;;  %s61_s20 = ssub.s32 %s774_s13, %s1336_s17 }
   0xc   : > { %p104_p6 = scmp.eq.s32.totalorder %s552_s15, 1  ;;  %p63_p7 = scmp.eq.s32.totalorder %s61_s20, 0 }
   0xd   : > { %p853_p8 = por %p79_p5, %p78_p3  ;;  %p110_p10 = scmp.eq.s32.totalorder %s553_s16, 1 }
   0xe   : > { %p857_p9 = por %p104_p6, %p72_p1  ;;  %p581_p13 = scmp.lt.s32.totalorder %s778_s14, 2 }
   0xf   : > { %s862_s23 = scalar_select %p63_p7, %s766_s11, %s65_s18  }
  0x10   : > { %s1322_s22 = scalar_select %p857_p9, 1, 0 }
  0x11   : > { %p864_p11 = por %p110_p10, %p78_p3  ;;  %s139_s25 = sand.u32 1, %s766_s11  }
  0x12   : > { %s567_s26 = smul.u32 96, %s139_s25  ;;  %s565_s27 = sshll.u32 %s774_s13, 9 }
  0x13   : > { %s1323_s24 = scalar_select %p864_p11, 1, 0 }
  0x14   : > { %p874_p0 = pnand %p581_p13, %p847_p4  ;;  %s881_s3 = scalar_lea.hbm %s1317_s1, %s565_s27 }
  0x15   : > { %s143_s4 = scalar_lea.vmem [#allocation2], %s567_s26  ;;  %s885_s6 = scalar_lea.sflag [#allocation3], %s139_s25 }
  0x16   : > { %s153_s5 = sshll.u32 %s143_s4, 4  ;;  %s666_s7 = scalar_lea.hbm %s881_s3, 1536  ;;  %s883_s5 = int_to_ptr.vmem [resolvable:$true] %s153_s5 }
  0x17   : > { %p667_p1 = scmp.ne.s32.totalorder %s881_s3, %s666_s7  ;;  %p668_p2 = pneg %p874_p0 }
  0x18   : > { %s671_s16 = scalar_lea.hbm %s1317_s1, 3072  ;;  %p672_p5 = scmp.lt.u32.totalorder %s881_s3, %s1317_s1 }
  0x19   : > { %p669_p3 = pnand %p668_p2, %p667_p1  ;;  %p673_p6 = scmp.lt.u32.totalorder %s671_s16, %s666_s7 }
  0x1a   : > { %p675_p10 = scmp.lt.u32.totalorder %s666_s7, %s881_s3 }
  0x1b   : > { %p670_p4 = pneg %p669_p3  ;;  %p674_p7 = por %p673_p6, %p672_p5 }
  0x1d   : > { %p676_p13 = por %p675_p10, %p674_p7 }
  0x1f   : > { %p677_p12 = pnand %p676_p13, %p670_p4 }
  0x21   : > { %680 = shalt.err (!%p677_p12)
}
  0x22   : > { %s681_s20 = scalar_lea.vmem %s883_s5, 1536  ;;  %s780_s25 = smov [#allocation2]  }
  0x23   : > { %p682_p1 = scmp.ne.s32.totalorder %s883_s5, %s681_s20  ;;  %s686_s26 = sshll.u32 %s780_s25, 4  ;;  %s687_s26 = int_to_ptr.vmem [resolvable:$false] %s686_s26 }
  0x24   : > { %s688_s27 = scalar_lea.vmem %s687_s26, 3072  ;;  %p689_p9 = scmp.lt.s32.totalorder %s883_s5, %s687_s26 }
  0x25   : > { %p684_p3 = pnand %p682_p1, %p668_p2  ;;  %p690_p5 = scmp.lt.s32.totalorder %s688_s27, %s681_s20 }
  0x27   : > { %p685_p11 = pneg %p684_p3  ;;  %p691_p6 = por %p690_p5, %p689_p9 }
  0x29   : > { %p692_p7 = pnand %p691_p6, %p685_p11 }
  0x2b   : > { %695 = shalt.err (!%p692_p7)
}
  0x2c   : > { %s781_s29 = smov 1024   ;;  %s782_s30 = smov 512  }
  0x2d   : > { %s783_s4 = smov 32   ;;  %p559_p12 = scmp.ge.s32.totalorder %s778_s14, 1 }
  0x2e   : > { %576 = dma.hbm_to_vmem [thread:$0]  (!%p874_p0), %s881_s3, 1536, %s883_s5, %s885_s6, %s781_s29, %s782_s30, %s783_s4  }
  0x2f   : > { %p161_p2 = scmp.lt.s32.totalorder %s778_s14, 3 }
  0x31   : > { %p162_p4 = pnand %p559_p12, %p161_p2 }
  0x32   : > { %s916_s7 = sand.u32 (!%p162_p4), 1, %s762_s10  }
  0x33   : > { %165 = sbr.rel (%p162_p4) target bundleno = 228 (0xe4), region = 28  ;;  %s168_s15 = scalar_lea.sflag (!%p162_p4), [#allocation3], %s916_s7 }
  0x34   : > { %s568_s8 = smul.u32 (!%p162_p4), 96, %s916_s7 }
  0x36   : > { %s922_s16 = scalar_lea.vmem (!%p162_p4), [#allocation2], %s568_s8 }
  0x3a   : > { %749 = dma.done.wait (%p853_p8), %s168_s15, 1536  }
  0x3b   : > { %751 = vsyncadd (%p853_p8), %s168_s15, 4294965760  ;;  %v784_v0 = vmov 0   ;;  %s560_s28 = sshll.u32 %s770_s12, 9  ;;  %v219_v2 = vld [vmem:[%s1316_s0] sm:$0xff]  ;;  %v221_v3 = vld [vmem:[%s1316_s0 + $0x10] sm:$0xff]  ;;  %v227_v40 = vlaneseq  ;;  %s1189_s20 = scalar_lea.vmem [#allocation5], %s568_s8 }
  0x3c   : > { %640 = vset.pattern.permute.xlu0 %v784_v0  ;;  %641 = vset.pattern.permute.xlu1 %v784_v0  ;;  %v223_v1 = vstv %s560_s28  ;;  %v220_v4 = vld [vmem:[%s1316_s0 + $0x8] sm:$0xff]  ;;  %v941_v8 = vld [vmem:[%s922_s16] sm:$0xff]  ;;  %v947_v10 = vld [vmem:[%s922_s16 + $0x10] sm:$0xff]  ;;  %s450_s25 = sshll.u32 %s1189_s20, 4  ;;  %s1261_s29 = scalar_lea.hbm %s1318_s2, %s560_s28  ;;  %s1263_s25 = int_to_ptr.vmem [resolvable:$true] %s450_s25 }
  0x3d   : > { %v224_v5 = vsub.s32 %v219_v2, %v223_v1  ;;  %v226_v6 = vsub.s32 %v221_v3, %v223_v1  ;;  %v225_v7 = vsub.s32 %v220_v4, %v223_v1  ;;  %v944_v9 = vld [vmem:[%s922_s16 + $0x8] sm:$0xff]  ;;  %v950_v11 = vld [vmem:[%s922_s16 + $0x18] sm:$0xff]  ;;  %v289_v12 = vmul.f32 %v941_v8, %v941_v8  ;;  %v957_v14 = vld [vmem:[%s922_s16 + $0x40] sm:$0xff]  ;;  %s434_s12 = scalar_lea.sflag [#allocation4], %s916_s7  ;;  %s696_s30 = scalar_lea.vmem %s1263_s25, 1536 }
  0x3e   : > { %v290_v13 = vmul.f32 %v944_v9, %v944_v9  ;;  %v291_v15 = vmul.f32 %v947_v10, %v947_v10  ;;  %v962_v16 = vld [vmem:[%s922_s16 + $0x48] sm:$0xff]  ;;  %v292_v17 = vmul.f32 %v950_v11, %v950_v11  ;;  %v967_v18 = vld [vmem:[%s922_s16 + $0x50] sm:$0xff]  ;;  %v972_v20 = vld [vmem:[%s922_s16 + $0x58] sm:$0xff]  ;;  %v297_v21 = vmul.f32 %v957_v14, %v957_v14  ;;  %p697_p8 = scmp.ne.s32.totalorder %s1263_s25, %s696_s30  ;;  %p1327_p9 = scmp.ne.s32.totalorder %s1322_s22, 0 }
  0x3f   : > { %233 = vperm.xlu0 %640, %v224_v5   ;;  %239 = vperm.xlu1 %641, %v226_v6   ;;  %v969_v19 = vsub.f32 1.0, %v289_v12  ;;  %v298_v23 = vmul.f32 %v962_v16, %v962_v16  ;;  %v981_v24 = vld [vmem:[%s922_s16 + $0x20] sm:$0xff]  ;;  %v299_v26 = vmul.f32 %v967_v18, %v967_v18  ;;  %v988_v27 = vld [vmem:[%s922_s16 + $0x28] sm:$0xff]  ;;  %v300_v29 = vmul.f32 %v972_v20, %v972_v20  ;;  %v995_v30 = vld [vmem:[%s922_s16 + $0x30] sm:$0xff]  ;;  %s787_s4 = smov [#allocation5]  }
  0x40   : > { %v976_v22 = vsub.f32 1.0, %v290_v13  ;;  %v983_v25 = vsub.f32 1.0, %v291_v15  ;;  %v990_v28 = vsub.f32 1.0, %v292_v17  ;;  %v998_v31 = vsub.f32 1.0, %v297_v21  ;;  %v1011_v36 = vld [vmem:[%s922_s16 + $0x38] sm:$0xff]  ;;  %p698_p11 = pnand %p697_p8, %p1327_p9  ;;  %s700_s8 = sshll.u32 %s787_s4, 4  ;;  %s701_s8 = int_to_ptr.vmem [resolvable:$false] %s700_s8 }
  0x41   : > { %642 = vrsqrt.f32 %v969_v19  ;;  %v293_v32 = vmul.f32 %v981_v24, %v981_v24  ;;  %v1003_v33 = vsub.f32 1.0, %v298_v23  ;;  %v294_v34 = vmul.f32 %v988_v27, %v988_v27  ;;  %s702_s15 = scalar_lea.vmem %s701_s8, 3072  ;;  %p703_p10 = scmp.lt.s32.totalorder %s1263_s25, %s701_s8 }
  0x42   : > { %644 = vrsqrt.f32 %v976_v22  ;;  %v1008_v35 = vsub.f32 1.0, %v299_v26  ;;  %v295_v37 = vmul.f32 %v995_v30, %v995_v30  ;;  %v1016_v38 = vsub.f32 1.0, %v300_v29  ;;  %p699_p0 = pneg %p698_p11  ;;  %p704_p13 = scmp.lt.s32.totalorder %s702_s15, %s696_s30 }
  0x43   : > { %236 = vperm.xlu0 %640, %v225_v7   ;;  %646 = vrsqrt.f32 %v983_v25  ;;  %v1019_v39 = vsub.f32 1.0, %v293_v32  ;;  %v296_v41 = vmul.f32 %v1011_v36, %v1011_v36  ;;  %v1024_v42 = vsub.f32 1.0, %v294_v34 }
  0x44   : > { %648 = vrsqrt.f32 %v990_v28  ;;  %v1027_v43 = vsub.f32 1.0, %v295_v37  ;;  %v1031_v44 = vand.u32 127, %v227_v40  ;;  %vm315_vm0 = vcmp.eq.f32.partialorder %v969_v19, inf  ;;  %p705_p1 = por %p704_p13, %p703_p10 }
  0x45   : > { %650 = vrsqrt.f32 %v998_v31  ;;  %v1033_v45 = vsub.f32 1.0, %v296_v41  ;;  %vm317_vm1 = vcmp.eq.f32.partialorder %v969_v19, 0.0  ;;  %v318_v56 = vand.u32 2147483648, %v969_v19 }
  0x46   : > { %652 = vrsqrt.f32 %v1003_v33  ;;  %v1038_v50 = vadd.s32 128, %v1031_v44  ;;  %v1042_v52 = vadd.s32 256, %v1031_v44  ;;  %v1045_v53 = vadd.s32 384, %v1031_v44  ;;  %p706_p3 = pnand %p705_p1, %p699_p0 }
  0x47   : > { %654 = vrsqrt.f32 %v1008_v35  ;;  %vm322_vm2 = vcmp.eq.f32.partialorder %v976_v22, inf  ;;  %v325_v57 = vand.u32 2147483648, %v976_v22  ;;  %vm329_vm3 = vcmp.eq.f32.partialorder %v983_v25, inf }
  0x48   : > { %656 = vrsqrt.f32 %v1016_v38  ;;  %v332_v59 = vand.u32 2147483648, %v983_v25  ;;  %vm336_vm4 = vcmp.eq.f32.partialorder %v990_v28, inf  ;;  %v339_v60 = vand.u32 2147483648, %v990_v28 }
  0x49   : > { %658 = vrsqrt.f32 %v1019_v39  ;;  %vm324_vm5 = vcmp.eq.f32.partialorder %v976_v22, 0.0  ;;  %vm331_vm6 = vcmp.eq.f32.partialorder %v983_v25, 0.0  ;;  %vm338_vm7 = vcmp.eq.f32.partialorder %v990_v28, 0.0 }
  0x4a   : > { %660 = vrsqrt.f32 %v1024_v42  ;;  %vm371_vm8 = vcmp.eq.f32.partialorder %v998_v31, inf  ;;  %vm373_vm9 = vcmp.eq.f32.partialorder %v998_v31, 0.0  ;;  %v374_v62 = vand.u32 2147483648, %v998_v31 }
  0x4b   : > { %v643_v46 = vpop.eup %642  ;;  %662 = vrsqrt.f32 %v1027_v43  ;;  %vm378_vm10 = vcmp.eq.f32.partialorder %v1003_v33, inf  ;;  %vm380_vm11 = vcmp.eq.f32.partialorder %v1003_v33, 0.0  ;;  %v381_v1 = vand.u32 2147483648, %v1003_v33 }
  0x4c   : > { %v645_v47 = vpop.eup %644  ;;  %664 = vrsqrt.f32 %v1033_v45  ;;  %v314_v55 = vmul.f32 %v643_v46, %v969_v19  ;;  %vm385_vm12 = vcmp.eq.f32.partialorder %v1008_v35, inf  ;;  %v388_v4 = vand.u32 2147483648, %v1008_v35 }
  0x4d   : > { %v647_v48 = vpop.eup %646  ;;  %v321_v0 = vmul.f32 %v645_v47, %v976_v22  ;;  %vm392_vm14 = vcmp.eq.f32.partialorder %v1016_v38, inf  ;;  %v395_v12 = vand.u32 2147483648, %v1016_v38  ;;  %vm343_vm13 = vcmp.eq.f32.partialorder %v1019_v39, inf }
  0x4e   : > { %v649_v49 = vpop.eup %648  ;;  %v316_v3 = vsel %vm315_vm0, %v969_v19, %v314_v55  ;;  %v328_v6 = vmul.f32 %v647_v48, %v983_v25  ;;  %vm345_vm0 = vcmp.eq.f32.partialorder %v1019_v39, 0.0  ;;  %v346_v29 = vand.u32 2147483648, %v1019_v39 }
  0x4f   : > { %v651_v51 = vpop.eup %650  ;;  %v335_v7 = vmul.f32 %v649_v49, %v990_v28  ;;  %v319_v21 = vsel %vm317_vm1, %v318_v56, %v316_v3  ;;  %v323_v23 = vsel %vm322_vm2, %v976_v22, %v321_v0  ;;  %vm350_vm15 = vcmp.eq.f32.partialorder %v1024_v42, inf }
  0x50   : > { %v653_v54 = vpop.eup %652  ;;  %v370_v13 = vmul.f32 %v651_v51, %v998_v31  ;;  %v330_v19 = vsel %vm329_vm3, %v983_v25, %v328_v6  ;;  %vm352_vm1 = vcmp.eq.f32.partialorder %v1024_v42, 0.0  ;;  %vm357_vm2 = vcmp.eq.f32.partialorder %v1027_v43, inf }
  0x51   : > { %v655_v58 = vpop.eup %654  ;;  %v377_v15 = vmul.f32 %v653_v54, %v1003_v33  ;;  %v337_v41 = vsel %vm336_vm4, %v990_v28, %v335_v7  ;;  %v353_v49 = vand.u32 2147483648, %v1024_v42  ;;  %vm359_vm3 = vcmp.eq.f32.partialorder %v1027_v43, 0.0 }
  0x52   : > { %v657_v61 = vpop.eup %656  ;;  %v384_v17 = vmul.f32 %v655_v58, %v1008_v35  ;;  %v372_v46 = vsel %vm371_vm8, %v998_v31, %v370_v13  ;;  %v360_v54 = vand.u32 2147483648, %v1027_v43  ;;  %vm364_vm4 = vcmp.eq.f32.partialorder %v1033_v45, inf }
  0x53   : > { %v659_v63 = vpop.eup %658  ;;  %v391_v26 = vmul.f32 %v657_v61, %v1016_v38  ;;  %v379_v47 = vsel %vm378_vm10, %v1003_v33, %v377_v15  ;;  %v333_v0 = vsel %vm331_vm6, %v332_v59, %v330_v19  ;;  %v375_v3 = vsel %vm373_vm9, %v374_v62, %v372_v46 }
  0x54   : > { %v661_v2 = vpop.eup %660  ;;  %v342_v34 = vmul.f32 %v659_v63, %v1019_v39  ;;  %v386_v48 = vsel %vm385_vm12, %v1008_v35, %v384_v17  ;;  %v326_v63 = vsel %vm324_vm5, %v325_v57, %v323_v23  ;;  %vm1325_vm8 = vcmp.eq.f32.partialorder %v1008_v35, 0.0 }
  0x55   : > { %v663_v5 = vpop.eup %662  ;;  %v349_v37 = vmul.f32 %v661_v2, %v1024_v42  ;;  %v393_v51 = vsel %vm392_vm14, %v1016_v38, %v391_v26  ;;  %v340_v2 = vsel %vm338_vm7, %v339_v60, %v337_v41  ;;  %v389_v6 = vsel %vm1325_vm8, %v388_v4, %v386_v48 }
  0x56   : > { %v665_v32 = vpop.eup %664  ;;  %v356_v40 = vmul.f32 %v663_v5, %v1027_v43  ;;  %v344_v56 = vsel %vm343_vm13, %v1019_v39, %v342_v34  ;;  %v382_v5 = vsel %vm380_vm11, %v381_v1, %v379_v47  ;;  %vm1326_vm10 = vcmp.eq.f32.partialorder %v1016_v38, 0.0 }
  0x57   : > { %v363_v55 = vmul.f32 %v665_v32, %v1033_v45  ;;  %v351_v58 = vsel %vm350_vm15, %v1024_v42, %v349_v37  ;;  %v396_v7 = vsel %vm1326_vm10, %v395_v12, %v393_v51  ;;  %v367_v22 = vand.u32 2147483648, %v1033_v45 }
  0x58   : > { %v358_v61 = vsel %vm357_vm2, %v1027_v43, %v356_v40  ;;  %v1141_v28 = vsel %vm345_vm0, %v346_v29, %v344_v56  ;;  %v1145_v31 = vsel %vm352_vm1, %v353_v49, %v351_v58  ;;  %v785_v38 = vmov 64.0  }
  0x59   : > { %v1149_v33 = vsel %vm359_vm3, %v360_v54, %v358_v61  ;;  %v1152_v35 = vsel %vm364_vm4, %v1033_v45, %v363_v55  ;;  %v786_v60 = vmov 0.0   ;;  %vm366_vm12 = vcmp.eq.f32.partialorder %v1033_v45, 0.0 }
  0xbe   : > { %v234_v57 = vpop.permute.xlu0 %233  ;;  %v240_v25 = vpop.permute.xlu1 %239 }
  0xbf   : > { %vm241_vm5 = vcmp.eq.s32.totalorder %v1031_v44, %v234_v57  ;;  %vm242_vm6 = vcmp.eq.s32.totalorder %v1038_v50, %v234_v57  ;;  %vm243_vm7 = vcmp.eq.s32.totalorder %v1042_v52, %v234_v57  ;;  %vm244_vm9 = vcmp.eq.s32.totalorder %v1045_v53, %v234_v57 }
  0xc0   : > { %v253_v39 = vsel %vm241_vm5, 56.165283, %v785_v38  ;;  %v254_v42 = vsel %vm242_vm6, 56.165283, %v785_v38  ;;  %v255_v43 = vsel %vm243_vm7, 56.165283, %v785_v38  ;;  %vm249_vm11 = vcmp.eq.s32.totalorder %v1031_v44, %v240_v25 }
  0xc1   : > { %v256_v59 = vsel %vm244_vm9, 56.165283, %v785_v38  ;;  %v265_v62 = vsel %vm241_vm5, 30.683235, %v786_v60  ;;  %v266_v1 = vsel %vm242_vm6, 30.683235, %v786_v60  ;;  %v277_v4 = vmul.f32 %v253_v39, %v941_v8 }
  0xc2   : > { %v267_v12 = vsel %vm243_vm7, 30.683235, %v786_v60  ;;  %v268_v13 = vsel %vm244_vm9, 30.683235, %v786_v60  ;;  %v278_v15 = vmul.f32 %v254_v42, %v944_v9  ;;  %v279_v17 = vmul.f32 %v255_v43, %v947_v10  ;;  %v237_v49 = vpop.permute.xlu0 %236 }
  0xc3   : > { %v280_v23 = vmul.f32 %v256_v59, %v950_v11  ;;  %v397_v26 = vmul.f32 %v319_v21, %v265_v62  ;;  %v398_v29 = vmul.f32 %v326_v63, %v266_v1  ;;  %v399_v32 = vmul.f32 %v333_v0, %v267_v12 }
  0xc4   : > { %v400_v34 = vmul.f32 %v340_v2, %v268_v13  ;;  %vm250_vm13 = vcmp.eq.s32.totalorder %v1038_v50, %v240_v25  ;;  %vm251_vm14 = vcmp.eq.s32.totalorder %v1042_v52, %v240_v25  ;;  %vm252_vm15 = vcmp.eq.s32.totalorder %v1045_v53, %v240_v25 }
  0xc5   : > { %v409_v8 = vsub.f32 %v277_v4, %v397_v26  ;;  %v410_v37 = vsub.f32 %v278_v15, %v398_v29  ;;  %v411_v40 = vsub.f32 %v279_v17, %v399_v32  ;;  %v261_v9 = vsel %vm249_vm11, 56.165283, %v785_v38 }
  0xc6   : > { %v412_v10 = vsub.f32 %v280_v23, %v400_v34  ;;  %v262_v11 = vsel %vm250_vm13, 56.165283, %v785_v38  ;;  %v263_v21 = vsel %vm251_vm14, 56.165283, %v785_v38  ;;  %v264_v19 = vsel %vm252_vm15, 56.165283, %v785_v38 }
  0xc7   : > { %421 = vst [vmem:[%s1189_s20] sm:$0xff] %v409_v8  ;;  %422 = vst [vmem:[%s1189_s20 + $0x8] sm:$0xff] %v410_v37  ;;  %v273_v41 = vsel %vm249_vm11, 30.683235, %v786_v60  ;;  %v274_v46 = vsel %vm250_vm13, 30.683235, %v786_v60  ;;  %v285_v48 = vmul.f32 %v261_v9, %v957_v14  ;;  %v286_v54 = vmul.f32 %v262_v11, %v962_v16 }
  0xc8   : > { %423 = vst [vmem:[%s1189_s20 + $0x10] sm:$0xff] %v411_v40  ;;  %v275_v47 = vsel %vm251_vm14, 30.683235, %v786_v60  ;;  %424 = vst [vmem:[%s1189_s20 + $0x18] sm:$0xff] %v412_v10  ;;  %v276_v51 = vsel %vm252_vm15, 30.683235, %v786_v60  ;;  %v287_v55 = vmul.f32 %v263_v21, %v967_v18  ;;  %v288_v56 = vmul.f32 %v264_v19, %v972_v20 }
  0xc9   : > { %v405_v58 = vmul.f32 %v375_v3, %v273_v41  ;;  %v406_v61 = vmul.f32 %v382_v5, %v274_v46  ;;  %v407_v63 = vmul.f32 %v389_v6, %v275_v47  ;;  %v408_v0 = vmul.f32 %v396_v7, %v276_v51 }
  0xca   : > { %vm245_vm0 = vcmp.eq.s32.totalorder %v1031_v44, %v237_v49  ;;  %vm246_vm1 = vcmp.eq.s32.totalorder %v1038_v50, %v237_v49  ;;  %vm247_vm2 = vcmp.eq.s32.totalorder %v1042_v52, %v237_v49  ;;  %vm248_vm3 = vcmp.eq.s32.totalorder %v1045_v53, %v237_v49 }
  0xcb   : > { %v417_v14 = vsub.f32 %v285_v48, %v405_v58  ;;  %v418_v16 = vsub.f32 %v286_v54, %v406_v61  ;;  %v419_v18 = vsub.f32 %v287_v55, %v407_v63  ;;  %v420_v20 = vsub.f32 %v288_v56, %v408_v0 }
  0xcc   : > { %v257_v2 = vsel %vm245_vm0, 56.165283, %v785_v38  ;;  %v258_v3 = vsel %vm246_vm1, 56.165283, %v785_v38  ;;  %v259_v5 = vsel %vm247_vm2, 56.165283, %v785_v38  ;;  %v368_v6 = vsel %vm366_vm12, %v367_v22, %v1152_v35 }
  0xcd   : > { %429 = vst [vmem:[%s1189_s20 + $0x40] sm:$0xff] %v417_v14  ;;  %430 = vst [vmem:[%s1189_s20 + $0x48] sm:$0xff] %v418_v16  ;;  %v260_v7 = vsel %vm248_vm3, 56.165283, %v785_v38  ;;  %v269_v57 = vsel %vm245_vm0, 30.683235, %v786_v60  ;;  %v281_v45 = vmul.f32 %v257_v2, %v981_v24  ;;  %v282_v38 = vmul.f32 %v258_v3, %v988_v27 }
  0xce   : > { %431 = vst [vmem:[%s1189_s20 + $0x50] sm:$0xff] %v419_v18  ;;  %432 = vst [vmem:[%s1189_s20 + $0x58] sm:$0xff] %v420_v20  ;;  %v270_v25 = vsel %vm246_vm1, 30.683235, %v786_v60  ;;  %v271_v22 = vsel %vm247_vm2, 30.683235, %v786_v60  ;;  %v283_v44 = vmul.f32 %v259_v5, %v995_v30  ;;  %v284_v24 = vmul.f32 %v260_v7, %v1011_v36 }
  0xcf   : > { %v272_v35 = vsel %vm248_vm3, 30.683235, %v786_v60  ;;  %v401_v50 = vmul.f32 %v1141_v28, %v269_v57  ;;  %v402_v52 = vmul.f32 %v1145_v31, %v270_v25  ;;  %v403_v53 = vmul.f32 %v1149_v33, %v271_v22 }
  0xd0   : > { %v404_v27 = vmul.f32 %v368_v6, %v272_v35 }
  0xd1   : > { %v413_v30 = vsub.f32 %v281_v45, %v401_v50  ;;  %v414_v39 = vsub.f32 %v282_v38, %v402_v52  ;;  %v415_v42 = vsub.f32 %v283_v44, %v403_v53 }
  0xd2   : > { %v416_v36 = vsub.f32 %v284_v24, %v404_v27 }
  0xd3   : > { %425 = vst [vmem:[%s1189_s20 + $0x20] sm:$0xff] %v413_v30  ;;  %426 = vst [vmem:[%s1189_s20 + $0x28] sm:$0xff] %v414_v39 }
  0xd4   : > { %427 = vst [vmem:[%s1189_s20 + $0x30] sm:$0xff] %v415_v42  ;;  %428 = vst [vmem:[%s1189_s20 + $0x38] sm:$0xff] %v416_v36 }
  0xd5   : > { %709 = shalt.err (!%p706_p3)
}
  0xd6   : > { %s710_s16 = scalar_lea.hbm %s1261_s29, 1536  ;;  %s714_s5 = scalar_lea.hbm %s1318_s2, 3072 }
  0xd7   : > { %p711_p5 = scmp.ne.s32.totalorder %s1261_s29, %s710_s16  ;;  %p715_p12 = scmp.lt.u32.totalorder %s1261_s29, %s1318_s2 }
  0xd8   : > { %p716_p2 = scmp.lt.u32.totalorder %s714_s5, %s710_s16  ;;  %p718_p8 = scmp.lt.u32.totalorder %s710_s16, %s1261_s29 }
  0xd9   : > { %p712_p6 = pnand %p711_p5, %p1327_p9 }
  0xda   : > { %p717_p4 = por %p716_p2, %p715_p12 }
  0xdb   : > { %p713_p7 = pneg %p712_p6 }
  0xdc   : > { %p719_p11 = por %p718_p8, %p717_p4 }
  0xde   : > { %p720_p0 = pnand %p719_p11, %p713_p7 }
  0xe0   : > { %723 = shalt.err (!%p720_p0)
}
  0xe1   : > { %s788_s18 = smov 512   ;;  %s789_s19 = smov 1024  }
  0xe2   : > { %s790_s20 = smov 32  }
  0xe3   : > { %571 = dma.vmem_to_hbm [thread:$0]  (%p1327_p9), %s1263_s25, 1536, %s1261_s29, %s434_s12, %s788_s18, %s789_s19, %s790_s20  }
  0xe4 PF: > { %s465_s26 = sand.u32 1, %s758_s9   ;;  %p1328_p10 = scmp.ne.s32.totalorder %s1323_s24, 0 }
  0xe5   : > { %p1329_p13 = scmp.ge.s32.totalorder %s778_s14, 2  ;;  %s466_s27 = scalar_lea.sflag [#allocation4], %s465_s26 }
  0xe7   : > { %p578_p1 = pnand %p1329_p13, %p1328_p10 }
  0xe9   : > { %753 = dma.done.wait (!%p578_p1), %s466_s27, 1536  }
  0xea   : > { %755 = vsyncadd (!%p578_p1), %s466_s27, 4294965760  ;;  %s18_s14 = sadd.s32 1, %s778_s14   ;;  %s1330_s9 = smov %s762_s10 }
  0xeb   : > { %p15_p3 = scmp.ge.s32.totalorder %s18_s14, 4   ;;  %s1331_s10 = smov %s766_s11 }
  0xec   : > { %s1332_s11 = smov %s862_s23  ;;  %s1333_s12 = smov %s774_s13 }
  0xed   : > { %s1334_s13 = smov %s1336_s17  ;;  %17 = sbr.rel (!%p15_p3) target bundleno = 6 (0x6), region = 76 }
  0xf4   :  { %471 = vsyncpa [#allocation3], 1 }
  0xf5   :  { %473 = vsyncpa [#allocation3 + $0x1], 1 }
  0xf6   :  { %474 = vsyncpa [#allocation4], 1 }
  0xf7   :  { %476 = vsyncpa [#allocation4 + $0x1], 1 }

</bundles_post_ra>
